<compile_context>
chip_gen: v7x
topology: tpu7x:2x2x1
jax: 0.10.0
libtpu: 0.0.40
codegen_flags: <defaults>
</compile_context>

<pallas_src>
import math
import functools

import jax
import jax.numpy as jnp
import numpy as np
from jax import lax
from jax.experimental import pallas as pl
from jax.experimental.pallas import tpu as pltpu


def _lsrnn_kernel(x_ref, w1_ref, b1_ref, w2r_ref, w2i_ref, b2r_ref, b2i_ref,
                  h0r_ref, h0i_ref, out_ref, *, seq_len):
    """One batch-tile (Bt sequences) per grid step.

    x_ref    : (Bt*L, D)    bf16  rows are batch-major, time-minor
    w1_ref   : (D, 4H)      bf16
    b1_ref   : (1, 4H)      f32
    w2r/w2i  : (4H, H)      bf16  real / imag column blocks of the 2nd Linear
    b2r/b2i  : (1, H)       f32
    h0r/h0i  : (1, H)       f32   shared unit-magnitude initial state
    out_ref  : (2, Bt*L, H) f32   plane 0 = real, plane 1 = imag
    """
    L = seq_len
    M = x_ref.shape[0]                       # Bt * L rows

    # ---- A_generator MLP: bf16 MXU matmuls, f32 accumulation (batch folded in M) ----
    x = x_ref[...]
    h = jnp.dot(x, w1_ref[...], preferred_element_type=jnp.float32) + b1_ref[...]
    h = jnp.maximum(h, 0.0).astype(jnp.bfloat16)
    ar = jnp.dot(h, w2r_ref[...], preferred_element_type=jnp.float32) + b2r_ref[...]
    ai = jnp.dot(h, w2i_ref[...], preferred_element_type=jnp.float32) + b2i_ref[...]
    H = ar.shape[1]

    # ---- normalize transitions to unit magnitude: one rsqrt (EUP) + two muls (VPU) ----
    inv = lax.rsqrt(ar * ar + ai * ai)
    pr = ar * inv                            # Re(trans), becomes running prefix product
    pi = ai * inv                            # Im(trans)

    # ---- inclusive prefix product along time (the recurrence) -----------------------
    # h_t = h_0 * prod_{j<=t} trans_j, and every factor is unit magnitude, so the
    # sequential complex recurrence is exactly a prefix product.  Hillis-Steele scan:
    # ceil(log2(L)) full-tile complex multiplies instead of L serial (1,H) steps.
    # The shift is a sublane concat with the complex identity (1 + 0i); the mask keeps
    # the scan inside each length-L segment so it never mixes different batch rows.
    t_idx = lax.broadcasted_iota(jnp.int32, (M, H), 0) % L   # hoisted out of the loop
    d = 1
    while d < L:                             # static Python loop, log2(L) iterations
        sr = jnp.concatenate([jnp.ones((d, H), jnp.float32), pr[:M - d, :]], axis=0)
        si = jnp.concatenate([jnp.zeros((d, H), jnp.float32), pi[:M - d, :]], axis=0)
        valid = t_idx >= d
        sr = jnp.where(valid, sr, 1.0)
        si = jnp.where(valid, si, 0.0)
        pr, pi = pr * sr - pi * si, pr * si + pi * sr
        d *= 2

    # ---- apply the shared initial state and store both planes with bulk stores ------
    h0r = h0r_ref[...]                       # (1, H) broadcasts over (M, H)
    h0i = h0i_ref[...]
    out_ref[0] = pr * h0r - pi * h0i
    out_ref[1] = pr * h0i + pi * h0r


def _pick_batch_tile(batch, seq_len, max_rows=1024):
    """Largest divisor of `batch` that keeps >= 2 grid steps (so v7x's two
    TensorCores both get work via the "parallel" axis) and a bounded row count."""
    if batch < 2:
        return batch
    best = 1
    for bt in range(1, batch // 2 + 1):
        if batch % bt == 0 and bt * seq_len <= max_rows:
            best = bt
    return best


@functools.partial(jax.jit, static_argnames=("hidden_size", "batch_tile"))
def lsrnn_block(x, w1, b1, w2, b2, init_r, init_i, *, hidden_size, batch_tile=None):
    B, L, D = x.shape
    H = hidden_size
    H4 = 4 * H
    Bt = _pick_batch_tile(B, L) if batch_tile is None else batch_tile
    assert B % Bt == 0, "batch_tile must divide batch"
    M = Bt * L

    # bf16 matmul operands: peak MXU throughput + half the HBM->VMEM DMA bytes.
    # Biases / init state stay f32 (added after f32 accumulation).
    x2d = x.reshape(B * L, D).astype(jnp.bfloat16)
    w1b = w1.astype(jnp.bfloat16)
    # Split the 2nd Linear into real / imag column blocks so the kernel never has to
    # lane-slice its matmul output at an unaligned (non-128) offset.
    w2r = w2[:, :H].astype(jnp.bfloat16)
    w2i = w2[:, H:].astype(jnp.bfloat16)
    b2r = b2[:, :H]
    b2i = b2[:, H:]

    out = pl.pallas_call(
        functools.partial(_lsrnn_kernel, seq_len=L),
        out_shape=jax.ShapeDtypeStruct((2, B * L, H), jnp.float32),
        grid_spec=pltpu.PrefetchScalarGridSpec(
            num_scalar_prefetch=0,
            grid=(B // Bt,),
            in_specs=[
                pl.BlockSpec((M, D), lambda b: (b, 0)),      # x rows of this batch tile
                # Grid-invariant weights.  For production-sized D/H on v7x (64 MiB VMEM),
                # add pipeline_mode=pl.Buffered(1) here to avoid double-buffering them.
                pl.BlockSpec((D, H4), lambda b: (0, 0)),     # W1
                pl.BlockSpec((1, H4), lambda b: (0, 0)),     # b1
                pl.BlockSpec((H4, H), lambda b: (0, 0)),     # W2 real cols
                pl.BlockSpec((H4, H), lambda b: (0, 0)),     # W2 imag cols
                pl.BlockSpec((1, H), lambda b: (0, 0)),      # b2 real
                pl.BlockSpec((1, H), lambda b: (0, 0)),      # b2 imag
                pl.BlockSpec((1, H), lambda b: (0, 0)),      # init_state real
                pl.BlockSpec((1, H), lambda b: (0, 0)),      # init_state imag
            ],
            out_specs=pl.BlockSpec((2, M, H), lambda b: (0, b, 0)),
        ),
        compiler_params=pltpu.CompilerParams(
            # Batch tiles are independent -> shard the grid across v7x's 2 TensorCores.
            dimension_semantics=("parallel",),
            vmem_limit_bytes=32 * 1024 * 1024,
        ),
    )(x2d, w1b, b1, w2r, w2i, b2r, b2i, init_r, init_i)

    return jax.lax.complex(out[0], out[1]).reshape(B, L, H)


def init_params(key, embed_size, hidden_size):
    """Deterministic init mimicking nn.Linear (uniform +-1/sqrt(fan_in)) and the
    random-phase unit-magnitude init_state buffer."""
    H, D = hidden_size, embed_size
    k1, k2, k3, k4, k5 = jax.random.split(key, 5)
    lim1 = 1.0 / math.sqrt(D)
    w1 = jax.random.uniform(k1, (D, 4 * H), jnp.float32, -lim1, lim1)
    b1 = jax.random.uniform(k2, (1, 4 * H), jnp.float32, -lim1, lim1)
    lim2 = 1.0 / math.sqrt(4 * H)
    w2 = jax.random.uniform(k3, (4 * H, 2 * H), jnp.float32, -lim2, lim2)
    b2 = jax.random.uniform(k4, (1, 2 * H), jnp.float32, -lim2, lim2)
    phases = jax.random.uniform(k5, (1, H), jnp.float32, 0.0, 2.0 * math.pi)
    init_r = jnp.cos(phases)   # exp(i*phi).real
    init_i = jnp.sin(phases)   # exp(i*phi).imag
    return w1, b1, w2, b2, init_r, init_i


def reference(x, w1, b1, w2, b2, init_r, init_i, hidden_size,
              matmul_dtype=jnp.float32):
    """Pure-JAX mirror of the PyTorch forward.  `matmul_dtype` sets the precision of
    the two Linear matmul inputs (the Pallas kernel feeds the MXU bf16 inputs with
    f32 accumulation); everything else is f32/complex64."""
    H = hidden_size
    h = jnp.dot(x.astype(matmul_dtype), w1.astype(matmul_dtype),
                preferred_element_type=jnp.float32) + b1[0]
    h = jnp.maximum(h, 0.0)
    a = jnp.dot(h.astype(matmul_dtype), w2.astype(matmul_dtype),
                preferred_element_type=jnp.float32) + b2[0]
    trans = jax.lax.complex(a[..., :H], a[..., H:])
    trans = trans / jnp.abs(trans)
    hidden = jnp.broadcast_to(jax.lax.complex(init_r[0], init_i[0])[None, :],
                              (x.shape[0], H))
    outs = []
    for i in range(x.shape[1]):
        hidden = trans[:, i, :] * hidden
        outs.append(hidden)
    return jnp.stack(outs, axis=1)


if __name__ == "__main__":
    B, L, D, H = 8, 8, 32, 32
    key = jax.random.PRNGKey(0)
    kx, kp = jax.random.split(key)
    x = jax.random.normal(kx, (B, L, D), jnp.float32)
    params = init_params(kp, embed_size=D, hidden_size=H)

    out = lsrnn_block(x, *params, hidden_size=H)
    out = jax.block_until_ready(out)

    # Validate against a precision-matched reference (the kernel runs its matmuls in
    # bf16 on the MXU with f32 accumulation, per the perf review).  Tolerance covers
    # MXU accumulation-order and rsqrt/abs rounding differences.
    ref = reference(x, *params, hidden_size=H, matmul_dtype=jnp.bfloat16)
    np.testing.assert_allclose(np.asarray(out), np.asarray(ref), rtol=1e-3, atol=1e-3)

    print("KERNEL_OK")
</pallas_src>

<mosaic_0001>
module attributes {stable_mosaic.version = 11 : i64} {
  func.func @_lsrnn_kernel(%arg0: i32, %arg1: memref<32x32xbf16, #tpu.memory_space<vmem>>, %arg2: memref<32x128xbf16, #tpu.memory_space<vmem>>, %arg3: memref<1x128xf32, #tpu.memory_space<vmem>>, %arg4: memref<128x32xbf16, #tpu.memory_space<vmem>>, %arg5: memref<128x32xbf16, #tpu.memory_space<vmem>>, %arg6: memref<1x32xf32, #tpu.memory_space<vmem>>, %arg7: memref<1x32xf32, #tpu.memory_space<vmem>>, %arg8: memref<1x32xf32, #tpu.memory_space<vmem>>, %arg9: memref<1x32xf32, #tpu.memory_space<vmem>>, %arg10: memref<2x32x32xf32, #tpu.memory_space<vmem>>) attributes {dimension_semantics = [#tpu.dimension_semantics<parallel>], iteration_bounds = array<i64: 2>, scalar_prefetch = 0 : i64, scratch_operands = 0 : i64, tpu.core_type = #tpu.core_type<tc>, window_params = [{transform_indices = @transform_0, window_bounds = array<i64: 32, 32>}, {pipeline_mode = #tpu.pipeline_mode<synchronous>, transform_indices = @transform_1, window_bounds = array<i64: 32, 128>}, {pipeline_mode = #tpu.pipeline_mode<synchronous>, transform_indices = @transform_2, window_bounds = array<i64: 1, 128>}, {pipeline_mode = #tpu.pipeline_mode<synchronous>, transform_indices = @transform_3, window_bounds = array<i64: 128, 32>}, {pipeline_mode = #tpu.pipeline_mode<synchronous>, transform_indices = @transform_4, window_bounds = array<i64: 128, 32>}, {pipeline_mode = #tpu.pipeline_mode<synchronous>, transform_indices = @transform_5, window_bounds = array<i64: 1, 32>}, {pipeline_mode = #tpu.pipeline_mode<synchronous>, transform_indices = @transform_6, window_bounds = array<i64: 1, 32>}, {pipeline_mode = #tpu.pipeline_mode<synchronous>, transform_indices = @transform_7, window_bounds = array<i64: 1, 32>}, {pipeline_mode = #tpu.pipeline_mode<synchronous>, transform_indices = @transform_8, window_bounds = array<i64: 1, 32>}, {transform_indices = @transform_9, window_bounds = array<i64: 2, 32, 32>}]} {
    %c0 = arith.constant 0 : index
    %c0_0 = arith.constant 0 : index
    %0 = vector.load %arg1[%c0, %c0_0] : memref<32x32xbf16, #tpu.memory_space<vmem>>, vector<32x32xbf16>
    %c0_1 = arith.constant 0 : index
    %c0_2 = arith.constant 0 : index
    %1 = vector.load %arg2[%c0_1, %c0_2] : memref<32x128xbf16, #tpu.memory_space<vmem>>, vector<32x128xbf16>
    %cst = arith.constant dense<0.000000e+00> : vector<32x128xf32>
    %2 = tpu.matmul %0, %1, %cst {dimension_numbers = #tpu.dot_dimension_numbers<[1], [0], [0], [1], [0, 0, 1, 1], [], []>} : vector<32x32xbf16>, vector<32x128xbf16>, vector<32x128xf32> -> vector<32x128xf32>
    %c0_3 = arith.constant 0 : index
    %c0_4 = arith.constant 0 : index
    %3 = vector.load %arg3[%c0_3, %c0_4] : memref<1x128xf32, #tpu.memory_space<vmem>>, vector<1x128xf32>
    %4 = vector.broadcast %3 : vector<1x128xf32> to vector<32x128xf32>
    %5 = arith.addf %2, %4 : vector<32x128xf32>
    %cst_5 = arith.constant 0.000000e+00 : f32
    %6 = vector.broadcast %cst_5 : f32 to vector<32x128xf32>
    %7 = arith.maximumf %5, %6 : vector<32x128xf32>
    %8 = arith.truncf %7 : vector<32x128xf32> to vector<32x128xbf16>
    %c0_6 = arith.constant 0 : index
    %c0_7 = arith.constant 0 : index
    %9 = vector.load %arg4[%c0_6, %c0_7] : memref<128x32xbf16, #tpu.memory_space<vmem>>, vector<128x32xbf16>
    %cst_8 = arith.constant dense<0.000000e+00> : vector<32x32xf32>
    %10 = tpu.matmul %8, %9, %cst_8 {dimension_numbers = #tpu.dot_dimension_numbers<[1], [0], [0], [1], [0, 0, 1, 1], [], []>} : vector<32x128xbf16>, vector<128x32xbf16>, vector<32x32xf32> -> vector<32x32xf32>
    %c0_9 = arith.constant 0 : index
    %c0_10 = arith.constant 0 : index
    %11 = vector.load %arg6[%c0_9, %c0_10] : memref<1x32xf32, #tpu.memory_space<vmem>>, vector<1x32xf32>
    %12 = vector.broadcast %11 : vector<1x32xf32> to vector<32x32xf32>
    %13 = arith.addf %10, %12 : vector<32x32xf32>
    %c0_11 = arith.constant 0 : index
    %c0_12 = arith.constant 0 : index
    %14 = vector.load %arg5[%c0_11, %c0_12] : memref<128x32xbf16, #tpu.memory_space<vmem>>, vector<128x32xbf16>
    %cst_13 = arith.constant dense<0.000000e+00> : vector<32x32xf32>
    %15 = tpu.matmul %8, %14, %cst_13 {dimension_numbers = #tpu.dot_dimension_numbers<[1], [0], [0], [1], [0, 0, 1, 1], [], []>} : vector<32x128xbf16>, vector<128x32xbf16>, vector<32x32xf32> -> vector<32x32xf32>
    %c0_14 = arith.constant 0 : index
    %c0_15 = arith.constant 0 : index
    %16 = vector.load %arg7[%c0_14, %c0_15] : memref<1x32xf32, #tpu.memory_space<vmem>>, vector<1x32xf32>
    %17 = vector.broadcast %16 : vector<1x32xf32> to vector<32x32xf32>
    %18 = arith.addf %15, %17 : vector<32x32xf32>
    %19 = arith.mulf %13, %13 : vector<32x32xf32>
    %20 = arith.mulf %18, %18 : vector<32x32xf32>
    %21 = arith.addf %19, %20 : vector<32x32xf32>
    %22 = math.rsqrt %21 : vector<32x32xf32>
    %23 = arith.mulf %13, %22 : vector<32x32xf32>
    %24 = arith.mulf %18, %22 : vector<32x32xf32>
    %25 = tpu.iota {dimensions = array<i32: 0>} : vector<32x32xi32>
    %c8_i32 = arith.constant 8 : i32
    %c0_i32 = arith.constant 0 : i32
    %26 = arith.cmpi eq, %c8_i32, %c0_i32 : i32
    %c1_i32 = arith.constant 1 : i32
    %27 = arith.select %26, %c1_i32, %c8_i32 : i32
    %28 = vector.broadcast %27 : i32 to vector<32x32xi32>
    %29 = arith.remsi %25, %28 : vector<32x32xi32>
    %c0_i32_16 = arith.constant 0 : i32
    %30 = vector.broadcast %c0_i32_16 : i32 to vector<32x32xi32>
    %31 = arith.cmpi ne, %29, %30 : vector<32x32xi32>
    %c0_i32_17 = arith.constant 0 : i32
    %32 = vector.broadcast %c0_i32_17 : i32 to vector<32x32xi32>
    %33 = arith.cmpi slt, %29, %32 : vector<32x32xi32>
    %c0_i32_18 = arith.constant 0 : i32
    %34 = arith.cmpi slt, %27, %c0_i32_18 : i32
    %35 = vector.broadcast %34 : i1 to vector<32x32xi1>
    %36 = vector.broadcast %35 : vector<32x32xi1> to vector<32x32xi1>
    %37 = arith.xori %33, %36 : vector<32x32xi1>
    %38 = arith.andi %37, %31 : vector<32x32xi1>
    %39 = vector.broadcast %27 : i32 to vector<32x32xi32>
    %40 = arith.addi %29, %39 : vector<32x32xi32>
    %41 = arith.select %38, %40, %29 : vector<32x32xi1>, vector<32x32xi32>
    %cst_19 = arith.constant 1.000000e+00 : f32
    %42 = vector.broadcast %cst_19 : f32 to vector<1x32xf32>
    %43 = vector.extract_strided_slice %23 {offsets = [0, 0], sizes = [31, 32], strides = [1, 1]} : vector<32x32xf32> to vector<31x32xf32>
    %44 = tpu.concatenate %42, %43 in 0 : vector<1x32xf32>, vector<31x32xf32> -> vector<32x32xf32>
    %cst_20 = arith.constant 0.000000e+00 : f32
    %45 = vector.broadcast %cst_20 : f32 to vector<1x32xf32>
    %46 = vector.extract_strided_slice %24 {offsets = [0, 0], sizes = [31, 32], strides = [1, 1]} : vector<32x32xf32> to vector<31x32xf32>
    %47 = tpu.concatenate %45, %46 in 0 : vector<1x32xf32>, vector<31x32xf32> -> vector<32x32xf32>
    %c1_i32_21 = arith.constant 1 : i32
    %48 = vector.broadcast %c1_i32_21 : i32 to vector<32x32xi32>
    %49 = arith.cmpi sge, %41, %48 : vector<32x32xi32>
    %cst_22 = arith.constant 1.000000e+00 : f32
    %50 = vector.broadcast %cst_22 : f32 to vector<32x32xf32>
    %51 = arith.select %49, %44, %50 : vector<32x32xi1>, vector<32x32xf32>
    %cst_23 = arith.constant 0.000000e+00 : f32
    %52 = vector.broadcast %cst_23 : f32 to vector<32x32xf32>
    %53 = arith.select %49, %47, %52 : vector<32x32xi1>, vector<32x32xf32>
    %54 = arith.mulf %23, %51 : vector<32x32xf32>
    %55 = arith.mulf %24, %53 : vector<32x32xf32>
    %56 = arith.subf %54, %55 : vector<32x32xf32>
    %57 = arith.mulf %23, %53 : vector<32x32xf32>
    %58 = arith.mulf %24, %51 : vector<32x32xf32>
    %59 = arith.addf %57, %58 : vector<32x32xf32>
    %cst_24 = arith.constant 1.000000e+00 : f32
    %60 = vector.broadcast %cst_24 : f32 to vector<2x32xf32>
    %61 = vector.extract_strided_slice %56 {offsets = [0, 0], sizes = [30, 32], strides = [1, 1]} : vector<32x32xf32> to vector<30x32xf32>
    %62 = tpu.concatenate %60, %61 in 0 : vector<2x32xf32>, vector<30x32xf32> -> vector<32x32xf32>
    %cst_25 = arith.constant 0.000000e+00 : f32
    %63 = vector.broadcast %cst_25 : f32 to vector<2x32xf32>
    %64 = vector.extract_strided_slice %59 {offsets = [0, 0], sizes = [30, 32], strides = [1, 1]} : vector<32x32xf32> to vector<30x32xf32>
    %65 = tpu.concatenate %63, %64 in 0 : vector<2x32xf32>, vector<30x32xf32> -> vector<32x32xf32>
    %c2_i32 = arith.constant 2 : i32
    %66 = vector.broadcast %c2_i32 : i32 to vector<32x32xi32>
    %67 = arith.cmpi sge, %41, %66 : vector<32x32xi32>
    %cst_26 = arith.constant 1.000000e+00 : f32
    %68 = vector.broadcast %cst_26 : f32 to vector<32x32xf32>
    %69 = arith.select %67, %62, %68 : vector<32x32xi1>, vector<32x32xf32>
    %cst_27 = arith.constant 0.000000e+00 : f32
    %70 = vector.broadcast %cst_27 : f32 to vector<32x32xf32>
    %71 = arith.select %67, %65, %70 : vector<32x32xi1>, vector<32x32xf32>
    %72 = arith.mulf %56, %69 : vector<32x32xf32>
    %73 = arith.mulf %59, %71 : vector<32x32xf32>
    %74 = arith.subf %72, %73 : vector<32x32xf32>
    %75 = arith.mulf %56, %71 : vector<32x32xf32>
    %76 = arith.mulf %59, %69 : vector<32x32xf32>
    %77 = arith.addf %75, %76 : vector<32x32xf32>
    %cst_28 = arith.constant 1.000000e+00 : f32
    %78 = vector.broadcast %cst_28 : f32 to vector<4x32xf32>
    %79 = vector.extract_strided_slice %74 {offsets = [0, 0], sizes = [28, 32], strides = [1, 1]} : vector<32x32xf32> to vector<28x32xf32>
    %80 = tpu.concatenate %78, %79 in 0 : vector<4x32xf32>, vector<28x32xf32> -> vector<32x32xf32>
    %cst_29 = arith.constant 0.000000e+00 : f32
    %81 = vector.broadcast %cst_29 : f32 to vector<4x32xf32>
    %82 = vector.extract_strided_slice %77 {offsets = [0, 0], sizes = [28, 32], strides = [1, 1]} : vector<32x32xf32> to vector<28x32xf32>
    %83 = tpu.concatenate %81, %82 in 0 : vector<4x32xf32>, vector<28x32xf32> -> vector<32x32xf32>
    %c4_i32 = arith.constant 4 : i32
    %84 = vector.broadcast %c4_i32 : i32 to vector<32x32xi32>
    %85 = arith.cmpi sge, %41, %84 : vector<32x32xi32>
    %cst_30 = arith.constant 1.000000e+00 : f32
    %86 = vector.broadcast %cst_30 : f32 to vector<32x32xf32>
    %87 = arith.select %85, %80, %86 : vector<32x32xi1>, vector<32x32xf32>
    %cst_31 = arith.constant 0.000000e+00 : f32
    %88 = vector.broadcast %cst_31 : f32 to vector<32x32xf32>
    %89 = arith.select %85, %83, %88 : vector<32x32xi1>, vector<32x32xf32>
    %90 = arith.mulf %74, %87 : vector<32x32xf32>
    %91 = arith.mulf %77, %89 : vector<32x32xf32>
    %92 = arith.subf %90, %91 : vector<32x32xf32>
    %93 = arith.mulf %74, %89 : vector<32x32xf32>
    %94 = arith.mulf %77, %87 : vector<32x32xf32>
    %95 = arith.addf %93, %94 : vector<32x32xf32>
    %c0_32 = arith.constant 0 : index
    %c0_33 = arith.constant 0 : index
    %96 = vector.load %arg8[%c0_32, %c0_33] : memref<1x32xf32, #tpu.memory_space<vmem>>, vector<1x32xf32>
    %c0_34 = arith.constant 0 : index
    %c0_35 = arith.constant 0 : index
    %97 = vector.load %arg9[%c0_34, %c0_35] : memref<1x32xf32, #tpu.memory_space<vmem>>, vector<1x32xf32>
    %98 = vector.broadcast %96 : vector<1x32xf32> to vector<32x32xf32>
    %99 = arith.mulf %92, %98 : vector<32x32xf32>
    %100 = vector.broadcast %97 : vector<1x32xf32> to vector<32x32xf32>
    %101 = arith.mulf %95, %100 : vector<32x32xf32>
    %102 = arith.subf %99, %101 : vector<32x32xf32>
    %c0_36 = arith.constant 0 : index
    %c0_37 = arith.constant 0 : index
    %c0_38 = arith.constant 0 : index
    %103 = vector.load %arg10[%c0_36, %c0_37, %c0_38] : memref<2x32x32xf32, #tpu.memory_space<vmem>>, vector<1x32x32xf32>
    %104 = vector.shape_cast %103 : vector<1x32x32xf32> to vector<32x32xf32>
    %105 = vector.shape_cast %102 : vector<32x32xf32> to vector<1x32x32xf32>
    tpu.vector_store %arg10[%c0_36, %c0_37, %c0_38], %105 {strides = array<i32>} : memref<2x32x32xf32, #tpu.memory_space<vmem>>, vector<1x32x32xf32>,
    %106 = vector.broadcast %97 : vector<1x32xf32> to vector<32x32xf32>
    %107 = arith.mulf %92, %106 : vector<32x32xf32>
    %108 = vector.broadcast %96 : vector<1x32xf32> to vector<32x32xf32>
    %109 = arith.mulf %95, %108 : vector<32x32xf32>
    %110 = arith.addf %107, %109 : vector<32x32xf32>
    %c1 = arith.constant 1 : index
    %c0_39 = arith.constant 0 : index
    %c0_40 = arith.constant 0 : index
    %111 = vector.load %arg10[%c1, %c0_39, %c0_40] : memref<2x32x32xf32, #tpu.memory_space<vmem>>, vector<1x32x32xf32>
    %112 = vector.shape_cast %111 : vector<1x32x32xf32> to vector<32x32xf32>
    %113 = vector.shape_cast %110 : vector<32x32xf32> to vector<1x32x32xf32>
    tpu.vector_store %arg10[%c1, %c0_39, %c0_40], %113 {strides = array<i32>} : memref<2x32x32xf32, #tpu.memory_space<vmem>>, vector<1x32x32xf32>,
    return
  }
  func.func @transform_0(%arg0: i32) -> (i32, i32) {
    %c0_i32 = arith.constant 0 : i32
    %c0_i32_0 = arith.constant 0 : i32
    return %arg0, %c0_i32 : i32, i32
  }
  func.func @transform_1(%arg0: i32) -> (i32, i32) {
    %c0_i32 = arith.constant 0 : i32
    %c0_i32_0 = arith.constant 0 : i32
    %c0_i32_1 = arith.constant 0 : i32
    return %c0_i32, %c0_i32_0 : i32, i32
  }
  func.func @transform_2(%arg0: i32) -> (i32, i32) {
    %c0_i32 = arith.constant 0 : i32
    %c0_i32_0 = arith.constant 0 : i32
    %c0_i32_1 = arith.constant 0 : i32
    return %c0_i32, %c0_i32_0 : i32, i32
  }
  func.func @transform_3(%arg0: i32) -> (i32, i32) {
    %c0_i32 = arith.constant 0 : i32
    %c0_i32_0 = arith.constant 0 : i32
    %c0_i32_1 = arith.constant 0 : i32
    return %c0_i32, %c0_i32_0 : i32, i32
  }
  func.func @transform_4(%arg0: i32) -> (i32, i32) {
    %c0_i32 = arith.constant 0 : i32
    %c0_i32_0 = arith.constant 0 : i32
    %c0_i32_1 = arith.constant 0 : i32
    return %c0_i32, %c0_i32_0 : i32, i32
  }
  func.func @transform_5(%arg0: i32) -> (i32, i32) {
    %c0_i32 = arith.constant 0 : i32
    %c0_i32_0 = arith.constant 0 : i32
    %c0_i32_1 = arith.constant 0 : i32
    return %c0_i32, %c0_i32_0 : i32, i32
  }
  func.func @transform_6(%arg0: i32) -> (i32, i32) {
    %c0_i32 = arith.constant 0 : i32
    %c0_i32_0 = arith.constant 0 : i32
    %c0_i32_1 = arith.constant 0 : i32
    return %c0_i32, %c0_i32_0 : i32, i32
  }
  func.func @transform_7(%arg0: i32) -> (i32, i32) {
    %c0_i32 = arith.constant 0 : i32
    %c0_i32_0 = arith.constant 0 : i32
    %c0_i32_1 = arith.constant 0 : i32
    return %c0_i32, %c0_i32_0 : i32, i32
  }
  func.func @transform_8(%arg0: i32) -> (i32, i32) {
    %c0_i32 = arith.constant 0 : i32
    %c0_i32_0 = arith.constant 0 : i32
    %c0_i32_1 = arith.constant 0 : i32
    return %c0_i32, %c0_i32_0 : i32, i32
  }
  func.func @transform_9(%arg0: i32) -> (i32, i32, i32) {
    %c0_i32 = arith.constant 0 : i32
    %c0_i32_0 = arith.constant 0 : i32
    %c0_i32_1 = arith.constant 0 : i32
    return %c0_i32, %arg0, %c0_i32_0 : i32, i32, i32
  }
}

</mosaic_0001>

<bundles_post_ra>
// kernel: custom-call
= control target key start
LH: loop header
LB: loop body
LE: loop exit
PB: predicated region body
PF: predicated region fallthrough
CT: control target
= control target key end

     0   :  { %s126_s0 = inlined_call_operand.vmem [shape: f32[8,8,32], index: 0, kind: input, shape index: {}]   ;;  %s127_s1 = inlined_call_operand.vmem [shape: f32[8,8,32], index: 1, kind: input, shape index: {}]   ;;  %s128_s2 = inlined_call_operand.hbm [shape: c64[8,8,32], index: 2, kind: output, shape index: {}]  }
   0x1   :  { %s87_s11 = scalar_lea.hbm %s128_s2, 1024 }
   0x2   :  { %4 = vsyncpa [#allocation0], 0  ;;  %s5_s14 = sshll.u32 %s126_s0, 4  ;;  %s6_s14 = int_to_ptr.vmem [resolvable:$true] %s5_s14 }
   0x3   :  { %s18_s15 = scalar_lea.vmem %s6_s14, 1024  ;;  %p23_p1 = scmp.lt.s32.totalorder %s6_s14, %s6_s14 }
   0x4   :  { %p19_p0 = scmp.ne.s32.totalorder %s6_s14, %s18_s15  ;;  %p24_p2 = scmp.lt.s32.totalorder %s18_s15, %s18_s15 }
   0x6   :  { %p25_p3 = por %p24_p2, %p23_p1 }
   0x8   :  { %p26_p4 = pnand %p25_p3, %p19_p0 }
   0xa   :  { %29 = shalt.err (!%p26_p4)  }
   0xb   :  { %p31_p5 = scmp.ne.s32.totalorder %s128_s2, %s87_s11  ;;  %s32_s0 = scalar_lea.hbm %s128_s2, 2048 }
   0xc   :  { %p33_p6 = scmp.lt.u32.totalorder %s32_s0, %s87_s11  ;;  %p34_p7 = scmp.lt.u32.totalorder %s87_s11, %s128_s2 }
   0xe   :  { %p35_p8 = por %p34_p7, %p33_p6 }
  0x10   :  { %p36_p9 = pnand %p35_p8, %p31_p5 }
  0x12   :  { %39 = shalt.err (!%p36_p9)  }
  0x13   :  { %8 = dma.vmem_to_hbm [thread:$0]  %s6_s14, 1024, %s128_s2, [#allocation0] }
  0x14   :  { %65 = dma.done.wait [#allocation0], 1024  }
  0x15   :  { %66 = vsyncadd [#allocation0], 4294966272 }
  0x16   :  { %10 = vsyncpa [#allocation0], 1 }
  0x17   :  { %11 = vsyncpa [#allocation1], 0  ;;  %s12_s28 = sshll.u32 %s127_s1, 4  ;;  %s13_s28 = int_to_ptr.vmem [resolvable:$true] %s12_s28 }
  0x18   :  { %s40_s29 = scalar_lea.vmem %s13_s28, 1024  ;;  %p45_p11 = scmp.lt.s32.totalorder %s13_s28, %s13_s28 }
  0x19   :  { %p41_p10 = scmp.ne.s32.totalorder %s13_s28, %s40_s29  ;;  %p46_p12 = scmp.lt.s32.totalorder %s40_s29, %s40_s29 }
  0x1b   :  { %p47_p13 = por %p46_p12, %p45_p11 }
  0x1d   :  { %p48_p0 = pnand %p47_p13, %p41_p10 }
  0x1f   :  { %51 = shalt.err (!%p48_p0)  }
  0x20   :  { %p53_p1 = scmp.ne.s32.totalorder %s87_s11, %s32_s0  ;;  %p56_p2 = scmp.lt.u32.totalorder %s32_s0, %s32_s0 }
  0x22   :  { %p57_p3 = por %p56_p2, %p34_p7 }
  0x24   :  { %p59_p4 = por %p57_p3, %p33_p6 }
  0x26   :  { %p60_p5 = pnand %p59_p4, %p53_p1 }
  0x28   :  { %63 = shalt.err (!%p60_p5)  }
  0x29   :  { %15 = dma.vmem_to_hbm [thread:$0]  %s13_s28, 1024, %s87_s11, [#allocation1] }
  0x2a   :  { %67 = dma.done.wait [#allocation1], 1024  }
  0x2b   :  { %68 = vsyncadd [#allocation1], 4294966272 }
  0x2c   :  { %17 = vsyncpa [#allocation1], 1 }

// kernel: lsrnn_block.1
= control target key start
LH: loop header
LB: loop body
LE: loop exit
PB: predicated region body
PF: predicated region fallthrough
CT: control target
= control target key end

     0   :  { %s1364_s30 = smov 0   ;;  %s1366_s10 = smov 0   ;;  %s1666_s0 = inlined_call_operand.vmem [shape: bf16[64,32], index: 0, kind: input, shape index: {}]   ;;  %s1667_s1 = inlined_call_operand.vmem [shape: bf16[32,128], index: 1, kind: input, shape index: {}]   ;;  %s1668_s2 = inlined_call_operand.vmem [shape: f32[1,128], index: 2, kind: input, shape index: {}]   ;;  %s1669_s3 = inlined_call_operand.vmem [shape: bf16[128,32], index: 3, kind: input, shape index: {}]   ;;  %s1670_s4 = inlined_call_operand.vmem [shape: bf16[128,32], index: 4, kind: input, shape index: {}]   ;;  %s1671_s5 = inlined_call_operand.vmem [shape: f32[1,32], index: 5, kind: input, shape index: {}]   ;;  %s1672_s6 = inlined_call_operand.vmem [shape: f32[1,32], index: 6, kind: input, shape index: {}]   ;;  %s1673_s7 = inlined_call_operand.vmem [shape: f32[1,32], index: 7, kind: input, shape index: {}]   ;;  %s1674_s8 = inlined_call_operand.vmem [shape: f32[1,32], index: 8, kind: input, shape index: {}]   ;;  %s1675_s9 = inlined_call_operand.vmem [shape: f32[2,64,32], index: 9, kind: output, shape index: {}]  }
   0x1   :  { %s1368_s11 = smov 0  }
   0x2 LB: > { %s1377_s12 = sadd.s32 4294967295, %s1312_s11   ;;  %s1379_s13 = sadd.s32 1, %s1312_s11   ;;  %s1312_s11 = sphi %s1368_s11, %s1679_s11   ;;  %s1308_s10 = sphi %s1366_s10, %s1678_s10   ;;  %s1304_s30 = sphi %s1364_s30, %s1677_s30  }
   0x3   : > { %s217_s14 = ssub.s32 %s1312_s11, %s1379_s13  ;;  %s220_s15 = sadd.s32 1, %s1308_s10 }
   0x4   : > { %p218_p0 = scmp.eq.s32.totalorder %s217_s14, 0  ;;  %p230_p1 = scmp.ne.s32.totalorder %s1308_s10, %s1304_s30 }
   0x5   : > { %p231_p2 = scmp.eq.s32.totalorder %s1377_s12, 1  ;;  %p1125_p3 = scmp.ge.s32.totalorder %s1312_s11, 1 }
   0x6   : > { %s1387_s16 = scalar_select %p218_p0, %s1308_s10, %s220_s15  }
   0x7   : > { %p1389_p4 = por %p231_p2, %p230_p1  ;;  %p288_p5 = scmp.lt.s32.totalorder %s1312_s11, 3 }
   0x9   : > { %p289_p6 = pnand %p1125_p3, %p288_p5 }
   0xa   : > { %v1262_v0 = vld [vmem:[%s1667_s1] sm:$0xff] (!%p289_p6)   ;;  %s1127_s20 = sshll.u32 (!%p289_p6), %s1377_s12, 2  ;;  %v1263_v1 = vld [vmem:[%s1667_s1 + $0x8] sm:$0xff] (!%p289_p6)   ;;  %vm368_vm0 = vcmask (!%p289_p6), 261120   ;;  %v1270_v6 = vld [vmem:[%s1669_s3 + $0x10] sm:$0xff] (!%p289_p6)   ;;  %v694_v45 = vlaneseq (!%p289_p6)  ;;  %vm751_vm1 = vcmask (!%p289_p6), 1040384  }
   0xb   : > { %292 = sbr.rel (%p289_p6) target bundleno = 533 (0x215), region = 56  ;;  %p324_p7 = scmp.lt.s32.totalorder (!%p289_p6), %s1127_s20, 7  ;;  %1190 = vmatprep.subr.bf16.mxu0 (!%p289_p6), %v1262_v0  ;;  %v1266_v2 = vld [vmem:[%s1669_s3] sm:$0xff] (!%p289_p6)   ;;  %v1268_v4 = vld [vmem:[%s1669_s3 + $0x8] sm:$0xff] (!%p289_p6)   ;;  %v1272_v9 = vld [vmem:[%s1669_s3 + $0x18] sm:$0xff] (!%p289_p6)   ;;  %vm820_vm4 = vcmask (!%p289_p6), 1041408  }
   0xc   : > { %1191 = vmatpush3.bf16.msra.mxu0 (!%p289_p6), %v1262_v0  ;;  %v1267_v3 = vld [vmem:[%s1670_s4] sm:$0xff] (!%p289_p6)   ;;  %1198 = vmatprep.subr.bf16.mxu1 (!%p289_p6), %v1266_v2  ;;  %v1269_v5 = vld [vmem:[%s1670_s4 + $0x8] sm:$0xff] (!%p289_p6)   ;;  %v1271_v10 = vld [vmem:[%s1670_s4 + $0x10] sm:$0xff] (!%p289_p6)   ;;  %v695_v0 = vshrl.u32 (!%p289_p6), %v694_v45, 7  ;;  %vm889_vm8 = vcmask (!%p289_p6), 1043456   ;;  %s320_s21 = sand.u32 (!%p289_p6), 1, %s1304_s30  }
   0xd   : > { %1192 = vmatprep.subr.bf16.mxu0 (!%p289_p6), %v1263_v1  ;;  %1199 = vmatpush3.bf16.msra.mxu1 (!%p289_p6), %v1266_v2  ;;  %v1274_v11 = vld [vmem:[%s1669_s3 + $0x20] sm:$0xff] (!%p289_p6)   ;;  %v1273_v12 = vld [vmem:[%s1670_s4 + $0x18] sm:$0xff] (!%p289_p6)   ;;  %v1276_v13 = vld [vmem:[%s1669_s3 + $0x28] sm:$0xff] (!%p289_p6)   ;;  %s1126_s24 = sshll.u32 (!%p289_p6), %s320_s21, 6 }
   0xe   : > { %1200 = vmatprep.subr.bf16.mxu1 (!%p289_p6), %v1268_v4  ;;  %v1275_v14 = vld [vmem:[%s1670_s4 + $0x20] sm:$0xff] (!%p289_p6)   ;;  %v1277_v15 = vld [vmem:[%s1670_s4 + $0x28] sm:$0xff] (!%p289_p6)   ;;  %v1278_v16 = vld [vmem:[%s1669_s3 + $0x30] sm:$0xff] (!%p289_p6)   ;;  %s1587_s25 = scalar_lea.vmem (!%p289_p6), [#allocation2], %s1126_s24 }
   0xf   : > { %v1279_v17 = vld [vmem:[%s1670_s4 + $0x30] sm:$0xff] (!%p289_p6)   ;;  %v1280_v18 = vld [vmem:[%s1669_s3 + $0x38] sm:$0xff] (!%p289_p6)   ;;  %v1129_v20 = vld [vmem:[%s1668_s2] ss:$0 sm:$0xff] (!%p289_p6) }
  0x10   : > { %1193 = vmatpush3.bf16.msra.mxu0 (!%p289_p6), %v1263_v1  ;;  %v1281_v19 = vld [vmem:[%s1670_s4 + $0x38] sm:$0xff] (!%p289_p6)   ;;  %v1136_v35 = vld [vmem:[%s1671_s5] ss:$0 sm:$0xff] (!%p289_p6) }
  0x11   : > { %1218 = vmatprep.subr.bf16.mxu0 (!%p289_p6), %v1267_v3  ;;  %1201 = vmatpush3.bf16.msra.mxu1 (!%p289_p6), %v1268_v4  ;;  %v1145_v36 = vld [vmem:[%s1672_s6] ss:$0 sm:$0xff] (!%p289_p6)  ;;  %v696_v4 = vadd.s32 (!%p289_p6), 8, %v695_v0 }
  0x12   : > { %s1681_s20 = smov (!%p324_p7, %s1127_s20), 7  ;;  %1202 = vmatprep.subr.bf16.mxu1 %v1270_v6  ;;  %s1165_s26 = sshll.u32 (%p1389_p4), %s1377_s12, 5 }
  0x13   : > { %s1128_s29 = sshll.u32 %s1681_s20, 2 }
  0x14   : > { %s327_s15 = scalar_lea.vmem %s1666_s0, %s1128_s29  ;;  %s1010_s29 = scalar_lea.vmem (%p1389_p4), %s1675_s9, %s1165_s26 }
  0x15   : > { %v1264_v7 = vld [vmem:[%s327_s15] sm:$0xff]   ;;  %v1265_v8 = vld [vmem:[%s327_s15 + $0x8] sm:$0xff]   ;;  %1203 = vmatpush3.bf16.msra.mxu1 %v1270_v6  ;;  %v1462_v6 = vand.u32 7, %v695_v0 }
  0x16   : > { %1194 = vmatprep.mubr.msk.bf16.mxu0 %vm368_vm0, %v1264_v7  ;;  %1204 = vmatprep.subr.bf16.mxu1 %v1272_v9 }
  0x17   : > { %1195 = vmatmul.mubr.msk.bf16.vlgmr.msra.gmra.mrb[0].mxu0 %vm368_vm0, %v1265_v8  ;;  %v1466_v8 = vand.u32 7, %v696_v4  ;;  %vm780_vm2 = vcmp.ge.s32.totalorder %v1462_v6, 1  ;;  %vm849_vm7 = vcmp.ge.s32.totalorder %v1462_v6, 2  ;;  %vm918_vm9 = vcmp.ge.s32.totalorder %v1462_v6, 4  ;;  %v1561_v6 = vld [vmem:[%s1674_s8] ss:$0 sm:$0xff] }
  0x18   : > { %1219 = vmatpush3.bf16.msra.mxu0 %v1267_v3  ;;  %v698_v3 = vadd.s32 24, %v695_v0 }
  0x19   : > { %1220 = vmatprep.subr.bf16.mxu0 %v1269_v5  ;;  %1205 = vmatpush3.bf16.msra.mxu1 %v1272_v9  ;;  %vm781_vm5 = vcmp.ge.s32.totalorder %v1466_v8, 1  ;;  %vm850_vm11 = vcmp.ge.s32.totalorder %v1466_v8, 2  ;;  %vm919_vm14 = vcmp.ge.s32.totalorder %v1466_v8, 4 }
  0x1a   : > { %1206 = vmatprep.subr.bf16.mxu1 %v1274_v11  ;;  %v1464_v7 = vand.u32 7, %v698_v3 }
  0x1c   : > { %1221 = vmatpush3.bf16.msra.mxu0 %v1269_v5  ;;  %v697_v5 = vadd.s32 16, %v695_v0  ;;  %vm783_vm3 = vcmp.ge.s32.totalorder %v1464_v7, 1  ;;  %vm852_vm10 = vcmp.ge.s32.totalorder %v1464_v7, 2  ;;  %vm921_vm13 = vcmp.ge.s32.totalorder %v1464_v7, 4 }
  0x1d   : > { %1222 = vmatprep.subr.bf16.mxu0 %v1271_v10  ;;  %1207 = vmatpush3.bf16.msra.mxu1 %v1274_v11 }
  0x1e   : > { %1208 = vmatprep.subr.bf16.mxu1 %v1276_v13  ;;  %v1468_v9 = vand.u32 7, %v697_v5 }
  0x20   : > { %1223 = vmatpush3.bf16.msra.mxu0 %v1271_v10  ;;  %vm782_vm6 = vcmp.ge.s32.totalorder %v1468_v9, 1  ;;  %vm851_vm12 = vcmp.ge.s32.totalorder %v1468_v9, 2  ;;  %vm920_vm15 = vcmp.ge.s32.totalorder %v1468_v9, 4 }
  0x21   : > { %1224 = vmatprep.subr.bf16.mxu0 %v1273_v12  ;;  %1209 = vmatpush3.bf16.msra.mxu1 %v1276_v13 }
  0x22   : > { %1210 = vmatprep.subr.bf16.mxu1 %v1278_v16 }
  0x24   : > { %1225 = vmatpush3.bf16.msra.mxu0 %v1273_v12 }
  0x25   : > { %1226 = vmatprep.subr.bf16.mxu0 %v1275_v14  ;;  %1211 = vmatpush3.bf16.msra.mxu1 %v1278_v16 }
  0x26   : > { %1212 = vmatprep.subr.bf16.mxu1 %v1280_v18 }
  0x28   : > { %1227 = vmatpush3.bf16.msra.mxu0 %v1275_v14 }
  0x29   : > { %1228 = vmatprep.subr.bf16.mxu0 %v1277_v15  ;;  %1213 = vmatpush3.bf16.msra.mxu1 %v1280_v18 }
  0x2c   : > { %1229 = vmatpush3.bf16.msra.mxu0 %v1277_v15 }
  0x2d   : > { %1230 = vmatprep.subr.bf16.mxu0 %v1279_v17 }
  0x30   : > { %1231 = vmatpush3.bf16.msra.mxu0 %v1279_v17 }
  0x31   : > { %1232 = vmatprep.subr.bf16.mxu0 %v1281_v19 }
  0x34   : > { %1233 = vmatpush3.bf16.msra.mxu0 %v1281_v19 }
  0xea   : > { %v1196_v21 = vpop.f32.mrb[0].mxu0 }
  0xeb   : > { %v418_v22 = vadd.f32 %v1196_v21, %v1129_v20  ;;  %v409_v23 = vpop.f32.mrb[1].mxu0 }
  0xec   : > { %v410_v24 = vadd.f32 %v1129_v20, %v409_v23  ;;  %v1197_v25 = vpop.f32.mrb[2].mxu0 }
  0xed   : > { %v421_v26 = vadd.f32 %v1197_v25, %v1129_v20  ;;  %v412_v27 = vpop.f32.mrb[3].mxu0  ;;  %v426_v29 = vmax.f32 %v418_v22, 0.0 }
  0xee   : > { %v413_v28 = vadd.f32 %v1129_v20, %v412_v27  ;;  %v424_v31 = vmax.f32 %v410_v24, 0.0 }
  0xef   : > { %v427_v30 = vmax.f32 %v421_v26, 0.0 }
  0xf0   : > { %v425_v32 = vmax.f32 %v413_v28, 0.0 }
  0xf1   : > { %v429_v33 = vpack.c.bf16 %v427_v30, %v426_v29 }
  0xf2   : > { %v428_v34 = vpack.c.bf16 %v425_v32, %v424_v31 }
  0xf4   : > { %1214 = vmatprep.mubr.bf16.mxu1 %v428_v34  ;;  %1234 = vmatprep.mubr.bf16.mxu0 %v428_v34 }
  0xf5   : > { %1215 = vmatmul.mubr.bf16.vlgmr.msra.gmra.mrb[0].mxu1 %v429_v33  ;;  %1235 = vmatmul.mubr.bf16.vlgmr.msra.gmra.mrb[4].mxu0 %v429_v33 }
 0x1c8   : > { %v1216_v37 = vpop.f32.mrb[0].mxu1  ;;  %v1236_v38 = vpop.f32.mrb[4].mxu0 }
 0x1c9   : > { %v544_v39 = vadd.f32 %v1216_v37, %v1136_v35  ;;  %v664_v40 = vadd.f32 %v1236_v38, %v1145_v36  ;;  %v535_v41 = vpop.f32.mrb[1].mxu1  ;;  %v655_v42 = vpop.f32.mrb[5].mxu0 }
 0x1ca   : > { %v536_v43 = vadd.f32 %v1136_v35, %v535_v41  ;;  %v656_v44 = vadd.f32 %v1145_v36, %v655_v42  ;;  %v1217_v46 = vpop.f32.mrb[2].mxu1  ;;  %v1237_v47 = vpop.f32.mrb[6].mxu0 }
 0x1cb   : > { %v672_v48 = vmul.f32 %v544_v39, %v544_v39  ;;  %v676_v49 = vmul.f32 %v664_v40, %v664_v40  ;;  %v547_v50 = vadd.f32 %v1217_v46, %v1136_v35  ;;  %v667_v51 = vadd.f32 %v1237_v47, %v1145_v36  ;;  %v538_v52 = vpop.f32.mrb[3].mxu1  ;;  %v658_v53 = vpop.f32.mrb[7].mxu0 }
 0x1cc   : > { %v670_v54 = vmul.f32 %v536_v43, %v536_v43  ;;  %v674_v55 = vmul.f32 %v656_v44, %v656_v44  ;;  %v539_v56 = vadd.f32 %v1136_v35, %v538_v52  ;;  %v659_v57 = vadd.f32 %v1145_v36, %v658_v53 }
 0x1cd   : > { %v680_v58 = vadd.f32 %v676_v49, %v672_v48  ;;  %v673_v59 = vmul.f32 %v547_v50, %v547_v50  ;;  %v677_v60 = vmul.f32 %v667_v51, %v667_v51 }
 0x1ce   : > { %v678_v61 = vadd.f32 %v674_v55, %v670_v54  ;;  %v671_v62 = vmul.f32 %v539_v56, %v539_v56  ;;  %v675_v63 = vmul.f32 %v659_v57, %v659_v57 }
 0x1cf   : > { %1282 = vrsqrt.f32 %v680_v58  ;;  %v681_v1 = vadd.f32 %v677_v60, %v673_v59 }
 0x1d0   : > { %1284 = vrsqrt.f32 %v678_v61  ;;  %v679_v2 = vadd.f32 %v675_v63, %v671_v62 }
 0x1d1   : > { %1286 = vrsqrt.f32 %v681_v1 }
 0x1d2   : > { %1288 = vrsqrt.f32 %v679_v2 }
 0x1d9   : > { %v1283_v10 = vpop.eup %1282 }
 0x1da   : > { %v1285_v11 = vpop.eup %1284  ;;  %v1470_v12 = vmul.f32 %v1283_v10, %v544_v39  ;;  %v1472_v13 = vmul.f32 %v1283_v10, %v664_v40 }
 0x1db   : > { %v1287_v14 = vpop.eup %1286  ;;  %v686_v15 = vmul.f32 %v1285_v11, %v536_v43  ;;  %v690_v16 = vmul.f32 %v1285_v11, %v656_v44 }
 0x1dc   : > { %v1289_v17 = vpop.eup %1288  ;;  %v689_v18 = vmul.f32 %v1287_v14, %v547_v50  ;;  %v693_v19 = vmul.f32 %v1287_v14, %v667_v51  ;;  %v771_v24 = vrot.slane %v1472_v13, 7  ;;  %v755_v25 = vrot.slane %v1470_v12, 7 }
 0x1dd   : > { %v752_v20 = vrot.slane %v686_v15, 7  ;;  %v768_v21 = vrot.slane %v690_v16, 7  ;;  %v687_v22 = vmul.f32 %v1289_v17, %v539_v56  ;;  %v691_v23 = vmul.f32 %v1289_v17, %v659_v57 }
 0x1de   : > { %v757_v26 = vrot.slane %v689_v18, 7  ;;  %v773_v27 = vrot.slane %v693_v19, 7 }
 0x1df   : > { %v763_v28 = vsel %vm751_vm1, 1.0, %v752_v20  ;;  %v779_v29 = vsel %vm751_vm1, 0.0, %v768_v21  ;;  %v753_v30 = vrot.slane %v687_v22, 7  ;;  %v769_v31 = vrot.slane %v691_v23, 7 }
 0x1e0   : > { %v784_v32 = vsel %vm780_vm2, %v763_v28, 1.0  ;;  %v788_v33 = vsel %vm780_vm2, %v779_v29, 0.0  ;;  %v758_v34 = vsel %vm751_vm1, %v755_v25, %v757_v26  ;;  %v774_v35 = vsel %vm751_vm1, %v771_v24, %v773_v27 }
 0x1e1   : > { %v792_v36 = vmul.f32 %v784_v32, %v686_v15  ;;  %v796_v37 = vmul.f32 %v788_v33, %v690_v16  ;;  %v804_v38 = vmul.f32 %v788_v33, %v686_v15  ;;  %v808_v39 = vmul.f32 %v784_v32, %v690_v16 }
 0x1e2   : > { %v787_v40 = vsel %vm783_vm3, %v758_v34, 1.0  ;;  %v791_v41 = vsel %vm783_vm3, %v774_v35, 0.0  ;;  %v754_v42 = vsel %vm751_vm1, %v752_v20, %v753_v30  ;;  %v756_v43 = vsel %vm751_vm1, %v753_v30, %v755_v25 }
 0x1e3   : > { %v800_v44 = vsub.f32 %v792_v36, %v796_v37  ;;  %v1495_v45 = vadd.f32 %v808_v39, %v804_v38  ;;  %v795_v46 = vmul.f32 %v787_v40, %v689_v18  ;;  %v799_v47 = vmul.f32 %v791_v41, %v693_v19 }
 0x1e4   : > { %v807_v48 = vmul.f32 %v791_v41, %v689_v18  ;;  %v811_v49 = vmul.f32 %v787_v40, %v693_v19  ;;  %v770_v50 = vsel %vm751_vm1, %v768_v21, %v769_v31  ;;  %v772_v51 = vsel %vm751_vm1, %v769_v31, %v771_v24  ;;  %v1556_v40 = vld [vmem:[%s1673_s7] ss:$0 sm:$0xff] }
 0x1e5   : > { %v821_v52 = vrot.slane %v800_v44, 6  ;;  %v837_v53 = vrot.slane %v1495_v45, 6  ;;  %v1500_v54 = vsub.f32 %v795_v46, %v799_v47  ;;  %v785_v55 = vsel %vm781_vm5, %v754_v42, 1.0 }
 0x1e6   : > { %v1504_v56 = vadd.f32 %v811_v49, %v807_v48  ;;  %v786_v57 = vsel %vm782_vm6, %v756_v43, 1.0  ;;  %v789_v58 = vsel %vm781_vm5, %v770_v50, 0.0  ;;  %v790_v61 = vsel %vm782_vm6, %v772_v51, 0.0 }
 0x1e7   : > { %v832_v59 = vsel %vm820_vm4, 1.0, %v821_v52  ;;  %v848_v60 = vsel %vm820_vm4, 0.0, %v837_v53  ;;  %v793_v62 = vmul.f32 %v785_v55, %v687_v22  ;;  %v794_v1 = vmul.f32 %v786_v57, %v1470_v12 }
 0x1e8   : > { %v853_v63 = vsel %vm849_vm7, %v832_v59, 1.0  ;;  %v857_v0 = vsel %vm849_vm7, %v848_v60, 0.0  ;;  %v797_v10 = vmul.f32 %v789_v58, %v691_v23  ;;  %v798_v11 = vmul.f32 %v790_v61, %v1472_v13 }
 0x1e9   : > { %v861_v2 = vmul.f32 %v853_v63, %v800_v44  ;;  %v865_v3 = vmul.f32 %v857_v0, %v1495_v45  ;;  %v873_v4 = vmul.f32 %v857_v0, %v800_v44  ;;  %v877_v5 = vmul.f32 %v853_v63, %v1495_v45 }
 0x1ea   : > { %v805_v14 = vmul.f32 %v789_v58, %v687_v22  ;;  %v806_v15 = vmul.f32 %v790_v61, %v1470_v12  ;;  %v809_v18 = vmul.f32 %v785_v55, %v691_v23  ;;  %v810_v19 = vmul.f32 %v786_v57, %v1472_v13 }
 0x1eb   : > { %v1525_v16 = vsub.f32 %v861_v2, %v865_v3  ;;  %v1527_v17 = vadd.f32 %v877_v5, %v873_v4  ;;  %v801_v20 = vsub.f32 %v793_v62, %v797_v10  ;;  %v802_v21 = vsub.f32 %v794_v1, %v798_v11 }
 0x1ec   : > { %v813_v25 = vadd.f32 %v809_v18, %v805_v14  ;;  %v814_v12 = vadd.f32 %v810_v19, %v806_v15  ;;  %v826_v26 = vrot.slane %v1500_v54, 6  ;;  %v842_v27 = vrot.slane %v1504_v56, 6 }
 0x1ed   : > { %v890_v24 = vrot.slane %v1525_v16, 4  ;;  %v906_v22 = vrot.slane %v1527_v17, 4  ;;  %v822_v23 = vrot.slane %v801_v20, 6  ;;  %v824_v28 = vrot.slane %v802_v21, 6 }
 0x1ee   : > { %v838_v30 = vrot.slane %v813_v25, 6  ;;  %v840_v31 = vrot.slane %v814_v12, 6 }
 0x1ef   : > { %v901_v13 = vsel %vm889_vm8, 1.0, %v890_v24  ;;  %v917_v29 = vsel %vm889_vm8, 0.0, %v906_v22  ;;  %v823_v34 = vsel %vm820_vm4, %v821_v52, %v822_v23  ;;  %v825_v35 = vsel %vm820_vm4, %v822_v23, %v824_v28 }
 0x1f0   : > { %v922_v32 = vsel %vm918_vm9, %v901_v13, 1.0  ;;  %v926_v33 = vsel %vm918_vm9, %v917_v29, 0.0  ;;  %v827_v41 = vsel %vm820_vm4, %v824_v28, %v826_v26  ;;  %v839_v42 = vsel %vm820_vm4, %v837_v53, %v838_v30 }
 0x1f1   : > { %v930_v36 = vmul.f32 %v922_v32, %v1525_v16  ;;  %v934_v37 = vmul.f32 %v926_v33, %v1527_v17  ;;  %v942_v38 = vmul.f32 %v926_v33, %v1525_v16  ;;  %v946_v39 = vmul.f32 %v922_v32, %v1527_v17 }
 0x1f2   : > { %v841_v43 = vsel %vm820_vm4, %v838_v30, %v840_v31  ;;  %v843_v44 = vsel %vm820_vm4, %v840_v31, %v842_v27  ;;  %v854_v47 = vsel %vm850_vm11, %v823_v34, 1.0  ;;  %v855_v48 = vsel %vm851_vm12, %v825_v35, 1.0 }
 0x1f3   : > { %v938_v45 = vsub.f32 %v930_v36, %v934_v37  ;;  %v950_v46 = vadd.f32 %v946_v39, %v942_v38  ;;  %v856_v49 = vsel %vm852_vm10, %v827_v41, 1.0  ;;  %v858_v50 = vsel %vm850_vm11, %v839_v42, 0.0 }
 0x1f4   : > { %v859_v51 = vsel %vm851_vm12, %v841_v43, 0.0  ;;  %v860_v52 = vsel %vm852_vm10, %v843_v44, 0.0  ;;  %v862_v59 = vmul.f32 %v854_v47, %v801_v20  ;;  %v863_v60 = vmul.f32 %v855_v48, %v802_v21 }
 0x1f5   : > { %v962_v53 = vmul.f32 %v1556_v40, %v938_v45  ;;  %v972_v55 = vmul.f32 %v1561_v6, %v950_v46  ;;  %v984_v57 = vmul.f32 %v1561_v6, %v938_v45  ;;  %v988_v58 = vmul.f32 %v1556_v40, %v950_v46 }
 0x1f6   : > { %v864_v61 = vmul.f32 %v856_v49, %v1500_v54  ;;  %v866_v62 = vmul.f32 %v858_v50, %v813_v25  ;;  %v867_v1 = vmul.f32 %v859_v51, %v814_v12  ;;  %v868_v2 = vmul.f32 %v860_v52, %v1504_v56 }
 0x1f7   : > { %v976_v63 = vsub.f32 %v962_v53, %v972_v55  ;;  %v992_v0 = vadd.f32 %v988_v58, %v984_v57  ;;  %v874_v4 = vmul.f32 %v858_v50, %v801_v20  ;;  %v875_v5 = vmul.f32 %v859_v51, %v802_v21 }
 0x1f8   : > { %v870_v3 = vsub.f32 %v862_v59, %v866_v62  ;;  %v876_v10 = vmul.f32 %v860_v52, %v1500_v54  ;;  %v871_v11 = vsub.f32 %v863_v60, %v867_v1  ;;  %v872_v14 = vsub.f32 %v864_v61, %v868_v2 }
 0x1f9   : > { %980 = vst.msk [vmem:[%s1587_s25] sm:$0xff] %vm368_vm0, %v976_v63  ;;  %1156 = vst.msk [vmem:[%s1587_s25 + $0x20] sm:$0xff] %vm368_vm0, %v992_v0  ;;  %v878_v15 = vmul.f32 %v854_v47, %v813_v25  ;;  %v879_v18 = vmul.f32 %v855_v48, %v814_v12  ;;  %v880_v19 = vmul.f32 %v856_v49, %v1504_v56 }
 0x1fa   : > { %v891_v26 = vrot.slane %v870_v3, 4  ;;  %v893_v21 = vrot.slane %v871_v11, 4  ;;  %v895_v27 = vrot.slane %v872_v14, 4 }
 0x1fb   : > { %v882_v54 = vadd.f32 %v878_v15, %v874_v4  ;;  %v883_v20 = vadd.f32 %v879_v18, %v875_v5  ;;  %v884_v23 = vadd.f32 %v880_v19, %v876_v10 }
 0x1fc   : > { %v892_v28 = vsel %vm889_vm8, %v890_v24, %v891_v26  ;;  %v894_v13 = vsel %vm889_vm8, %v891_v26, %v893_v21  ;;  %v896_v25 = vsel %vm889_vm8, %v893_v21, %v895_v27 }
 0x1fd   : > { %v907_v12 = vrot.slane %v882_v54, 4  ;;  %v909_v56 = vrot.slane %v883_v20, 4  ;;  %v911_v29 = vrot.slane %v884_v23, 4  ;;  %v923_v30 = vsel %vm919_vm14, %v892_v28, 1.0 }
 0x1fe   : > { %v924_v31 = vsel %vm920_vm15, %v894_v13, 1.0  ;;  %v925_v32 = vsel %vm921_vm13, %v896_v25, 1.0  ;;  %v931_v33 = vmul.f32 %v923_v30, %v870_v3  ;;  %v947_v45 = vmul.f32 %v923_v30, %v882_v54 }
 0x1ff   : > { %v908_v16 = vsel %vm889_vm8, %v906_v22, %v907_v12  ;;  %v910_v24 = vsel %vm889_vm8, %v907_v12, %v909_v56  ;;  %v932_v34 = vmul.f32 %v924_v31, %v871_v11  ;;  %v912_v35 = vsel %vm889_vm8, %v909_v56, %v911_v29 }
 0x200   : > { %v927_v36 = vsel %vm919_vm14, %v908_v16, 0.0  ;;  %v928_v37 = vsel %vm920_vm15, %v910_v24, 0.0  ;;  %v933_v38 = vmul.f32 %v925_v32, %v872_v14  ;;  %v929_v39 = vsel %vm921_vm13, %v912_v35, 0.0  ;;  %v1060_v15 = vld [vmem:[%s1587_s25 + $0x20] sm:$0xff] (%p1389_p4) }
 0x201   : > { %v935_v41 = vmul.f32 %v927_v36, %v882_v54  ;;  %v936_v17 = vmul.f32 %v928_v37, %v883_v20  ;;  %v943_v42 = vmul.f32 %v927_v36, %v870_v3  ;;  %v937_v22 = vmul.f32 %v929_v39, %v884_v23  ;;  %1061 = vst [vmem:[%s1010_s29 + $0x40] sm:$0xff] (%p1389_p4), %v1060_v15 }
 0x202   : > { %v944_v43 = vmul.f32 %v928_v37, %v871_v11  ;;  %v945_v44 = vmul.f32 %v929_v39, %v872_v14  ;;  %v948_v48 = vmul.f32 %v924_v31, %v883_v20  ;;  %v949_v49 = vmul.f32 %v925_v32, %v884_v23 }
 0x203   : > { %v939_v46 = vsub.f32 %v931_v33, %v935_v41  ;;  %v940_v47 = vsub.f32 %v932_v34, %v936_v17  ;;  %v941_v8 = vsub.f32 %v933_v38, %v937_v22  ;;  %v951_v50 = vadd.f32 %v947_v45, %v943_v42 }
 0x204   : > { %v952_v51 = vadd.f32 %v948_v48, %v944_v43  ;;  %v953_v9 = vadd.f32 %v949_v49, %v945_v44 }
 0x205   : > { %v963_v52 = vmul.f32 %v1556_v40, %v939_v46  ;;  %v964_v7 = vmul.f32 %v1556_v40, %v940_v47  ;;  %v965_v53 = vmul.f32 %v1556_v40, %v941_v8  ;;  %v973_v55 = vmul.f32 %v1561_v6, %v951_v50 }
 0x206   : > { %v985_v57 = vmul.f32 %v1561_v6, %v939_v46  ;;  %v986_v58 = vmul.f32 %v1561_v6, %v940_v47  ;;  %v974_v59 = vmul.f32 %v1561_v6, %v952_v51  ;;  %v975_v60 = vmul.f32 %v1561_v6, %v953_v9  ;;  %1007 = sbr.rel (!%p1389_p4) target bundleno = 533 (0x215), region = 60 }
 0x207   : > { %v987_v61 = vmul.f32 %v1561_v6, %v941_v8  ;;  %v989_v62 = vmul.f32 %v1556_v40, %v951_v50  ;;  %v977_v63 = vsub.f32 %v963_v52, %v973_v55  ;;  %v990_v0 = vmul.f32 %v1556_v40, %v952_v51 }
 0x208   : > { %v991_v1 = vmul.f32 %v1556_v40, %v953_v9  ;;  %v978_v2 = vsub.f32 %v964_v7, %v974_v59  ;;  %v979_v3 = vsub.f32 %v965_v53, %v975_v60  ;;  %v1052_v40 = vld [vmem:[%s1587_s25] sm:$0xff] (%p1389_p4) }
 0x209   : > { %v993_v4 = vadd.f32 %v989_v62, %v985_v57  ;;  %981 = vst.msk [vmem:[%s1587_s25 + $0x8] sm:$0xff] %vm368_vm0, %v977_v63  ;;  %v994_v5 = vadd.f32 %v990_v0, %v986_v58  ;;  %1053 = vst [vmem:[%s1010_s29] sm:$0xff] (%p1389_p4), %v1052_v40 }
 0x20a   : > { %v995_v10 = vadd.f32 %v991_v1, %v987_v61  ;;  %982 = vst.msk [vmem:[%s1587_s25 + $0x10] sm:$0xff] %vm368_vm0, %v978_v2  ;;  %983 = vst.msk [vmem:[%s1587_s25 + $0x18] sm:$0xff] %vm368_vm0, %v979_v3 }
 0x20b   : > { %1157 = vst.msk [vmem:[%s1587_s25 + $0x28] sm:$0xff] %vm368_vm0, %v993_v4  ;;  %1158 = vst.msk [vmem:[%s1587_s25 + $0x30] sm:$0xff] %vm368_vm0, %v994_v5 }
 0x20c   : > { %1159 = vst.msk [vmem:[%s1587_s25 + $0x38] sm:$0xff] %vm368_vm0, %v995_v10 }
 0x210   : > { %v1054_v6 = vld [vmem:[%s1587_s25 + $0x8] sm:$0xff] }
 0x211   : > { %v1056_v11 = vld [vmem:[%s1587_s25 + $0x10] sm:$0xff]  ;;  %v1058_v14 = vld [vmem:[%s1587_s25 + $0x18] sm:$0xff]  ;;  %1055 = vst [vmem:[%s1010_s29 + $0x8] sm:$0xff] %v1054_v6 }
 0x212   : > { %v1062_v18 = vld [vmem:[%s1587_s25 + $0x28] sm:$0xff]  ;;  %1057 = vst [vmem:[%s1010_s29 + $0x10] sm:$0xff] %v1056_v11  ;;  %1059 = vst [vmem:[%s1010_s29 + $0x18] sm:$0xff] %v1058_v14  ;;  %v1064_v19 = vld [vmem:[%s1587_s25 + $0x30] sm:$0xff] }
 0x213   : > { %1063 = vst [vmem:[%s1010_s29 + $0x48] sm:$0xff] %v1062_v18  ;;  %v1066_v26 = vld [vmem:[%s1587_s25 + $0x38] sm:$0xff]  ;;  %1065 = vst [vmem:[%s1010_s29 + $0x50] sm:$0xff] %v1064_v19 }
 0x214   : > { %1067 = vst [vmem:[%s1010_s29 + $0x58] sm:$0xff] %v1066_v26 }
 0x215 PF: > { %p16_p8 = scmp.ge.s32.totalorder %s1379_s13, 4   ;;  %s1677_s30 = smov %s1308_s10 }
 0x216   : > { %s1678_s10 = smov %s1387_s16  ;;  %s1679_s11 = smov %s1379_s13 }
 0x217   :  { %18 = sbr.rel (!%p16_p8) target bundleno = 2 (0x2), region = 125 }

</bundles_post_ra>
